<compile_context>
chip_gen: v6e
topology: v6e:2x2x1
jax: 0.10.0
libtpu: 0.0.40
codegen_flags: <defaults>
</compile_context>

<pallas_src>
import functools

import jax
import jax.numpy as jnp
from jax.experimental import pallas as pl
from jax.experimental.pallas import tpu as pltpu

INPUT_DIM = 768
HIDDEN1 = 256
HIDDEN2 = 128
NUM_CLASSES = 4
OUT_PAD = 128          # lane-dense padded output width (multiple of 128)
BN_EPS = 1e-5
COMPUTE_DTYPE = jnp.bfloat16


def _round_up(n, m):
    return ((n + m - 1) // m) * m


def _mlp_kernel(x_ref, w1_ref, b1_ref, w2_ref, b2_ref, w3_ref, b3_ref, o_ref):
    # x arrives f32 (no wrapper-side cast => no extra HBM round trip); the bf16
    # cast here rides otherwise-idle VPU slots.
    x = x_ref[...].astype(COMPUTE_DTYPE)

    # Layer 1: Linear -> ReLU            (BN1 folded into w2/b2)
    h = jnp.dot(x, w1_ref[...], preferred_element_type=jnp.float32)
    h = jnp.maximum(h + b1_ref[...], 0.0)

    # Layer 2: Linear -> ReLU            (BN2 folded into w3/b3; dropout = identity in eval)
    h = jnp.dot(h.astype(w2_ref.dtype), w2_ref[...],
                preferred_element_type=jnp.float32)
    h = jnp.maximum(h + b2_ref[...], 0.0)

    # Layer 3: final Linear, lane-dense (padded to OUT_PAD columns), stored bf16.
    out = jnp.dot(h.astype(w3_ref.dtype), w3_ref[...],
                  preferred_element_type=jnp.float32)
    o_ref[...] = (out + b3_ref[...]).astype(o_ref.dtype)


def fold_params(params):
    """One-time preprocessing: fold eval-mode BatchNorm into the following
    Linear, zero-pad the final Linear to a 128-wide (lane-dense) output and
    cast weights to bf16 (accumulation stays f32 in the kernel)."""
    s1 = params["bn1_gamma"] / jnp.sqrt(params["bn1_var"] + BN_EPS)
    t1 = params["bn1_beta"] - params["bn1_mean"] * s1
    s2 = params["bn2_gamma"] / jnp.sqrt(params["bn2_var"] + BN_EPS)
    t2 = params["bn2_beta"] - params["bn2_mean"] * s2

    # (relu(x@w1+b1)*s1 + t1) @ w2 + b2 == relu(x@w1+b1) @ (s1[:,None]*w2) + (t1@w2 + b2)
    w2f = params["w2"] * s1[:, None]
    b2f = t1 @ params["w2"] + params["b2"]
    w3f = params["w3"] * s2[:, None]
    b3f = t2 @ params["w3"] + params["b3"]

    # Pad final layer so the kernel's output store is an unmasked, lane-dense vst.
    w3p = jnp.zeros((HIDDEN2, OUT_PAD), jnp.float32).at[:, :NUM_CLASSES].set(w3f)
    b3p = jnp.zeros((OUT_PAD,), jnp.float32).at[:NUM_CLASSES].set(b3f)

    row = lambda v: v.reshape(1, -1).astype(jnp.float32)
    return dict(
        w1=params["w1"].astype(COMPUTE_DTYPE),
        b1=row(params["b1"]),
        w2=w2f.astype(COMPUTE_DTYPE),
        b2=row(b2f),
        w3=w3p.astype(COMPUTE_DTYPE),
        b3=row(b3p),
    )


def _choose_batch_tile(B, tile_b):
    """Batch tile (multiple of 16 when the batch allows, always multiple of 8)
    that amortizes per-grid-step overhead and keeps the grid length >= 2 and
    even when the batch is large enough, so v7x's two TensorCores stay busy."""
    B16 = _round_up(max(B, 16), 16)
    n_tiles = pl.cdiv(B16, tile_b)
    if n_tiles == 1:
        if B16 >= 32:
            n_tiles = 2            # two balanced tiles -> both TCs on v7x
    elif n_tiles % 2:
        n_tiles += 1               # even grid -> balanced 2-TC split
    TB = _round_up(pl.cdiv(B16, n_tiles), 16)
    return min(TB, _round_up(B, 8))   # never use a tile wider than the batch itself


@functools.partial(jax.jit, static_argnames=("tile_b",))
def improved_classifier_forward(x, folded, tile_b=1024):
    """x: (B, INPUT_DIM) float32. folded: output of fold_params().
    Returns (B, NUM_CLASSES) float32."""
    B = x.shape[0]
    TB = _choose_batch_tile(B, tile_b)
    grid = (pl.cdiv(B, TB),)   # ragged last tile handled by Pallas partial blocks

    resident = lambda shape: pl.BlockSpec(shape, lambda i: (0, 0))
    # TODO(synk): per review, grid-invariant weight/bias specs could be single-
    # buffered via pipeline_mode=pl.Buffered(1); skipped to keep compilation
    # robust across jax builds (tiny VMEM saving at these weight sizes).

    cost = pl.CostEstimate(
        flops=2 * B * (INPUT_DIM * HIDDEN1 + HIDDEN1 * HIDDEN2 + HIDDEN2 * OUT_PAD),
        transcendentals=0,
        bytes_accessed=int(x.size) * 4
        + sum(int(v.size) * v.dtype.itemsize for v in folded.values())
        + B * OUT_PAD * 2,
    )

    out = pl.pallas_call(
        _mlp_kernel,
        out_shape=jax.ShapeDtypeStruct((B, OUT_PAD), jnp.bfloat16),
        grid=grid,
        in_specs=[
            pl.BlockSpec((TB, INPUT_DIM), lambda i: (i, 0)),   # x (f32), tiled over batch
            resident((INPUT_DIM, HIDDEN1)),                    # w1 (bf16, VMEM-resident)
            resident((1, HIDDEN1)),                            # b1
            resident((HIDDEN1, HIDDEN2)),                      # w2 (BN1 folded)
            resident((1, HIDDEN2)),                            # b2
            resident((HIDDEN2, OUT_PAD)),                      # w3 (BN2 folded, padded)
            resident((1, OUT_PAD)),                            # b3 (padded)
        ],
        out_specs=pl.BlockSpec((TB, OUT_PAD), lambda i: (i, 0)),
        compiler_params=pltpu.CompilerParams(
            dimension_semantics=("parallel",)),                # shard batch tiles across TCs
        cost_estimate=cost,
    )(x, folded["w1"], folded["b1"], folded["w2"], folded["b2"],
      folded["w3"], folded["b3"])

    # Drop lane padding, promote bf16 logits back to f32 for the caller.
    return out[:B, :NUM_CLASSES].astype(jnp.float32)


def init_params(key):
    """Deterministic PyTorch-style init (U(-1/sqrt(fan_in), 1/sqrt(fan_in)))."""
    ks = jax.random.split(key, 12)

    def linear_init(kw, kb, fan_in, fan_out):
        bound = 1.0 / jnp.sqrt(fan_in)
        # stored as (in, out) == PyTorch weight transposed
        w = jax.random.uniform(kw, (fan_in, fan_out), jnp.float32, -bound, bound)
        b = jax.random.uniform(kb, (fan_out,), jnp.float32, -bound, bound)
        return w, b

    w1, b1 = linear_init(ks[0], ks[1], INPUT_DIM, HIDDEN1)
    w2, b2 = linear_init(ks[2], ks[3], HIDDEN1, HIDDEN2)
    w3, b3 = linear_init(ks[4], ks[5], HIDDEN2, NUM_CLASSES)

    bn1_gamma = 1.0 + 0.1 * jax.random.normal(ks[6], (HIDDEN1,), jnp.float32)
    bn1_beta = 0.1 * jax.random.normal(ks[7], (HIDDEN1,), jnp.float32)
    bn1_mean = 0.05 * jax.random.normal(ks[8], (HIDDEN1,), jnp.float32)
    bn1_var = jnp.abs(1.0 + 0.1 * jax.random.normal(ks[9], (HIDDEN1,), jnp.float32))

    bn2_gamma = 1.0 + 0.1 * jax.random.normal(ks[10], (HIDDEN2,), jnp.float32)
    bn2_beta = 0.1 * jax.random.normal(ks[11], (HIDDEN2,), jnp.float32)
    bn2_mean = jnp.zeros((HIDDEN2,), jnp.float32)
    bn2_var = jnp.ones((HIDDEN2,), jnp.float32)

    return dict(w1=w1, b1=b1, w2=w2, b2=b2, w3=w3, b3=b3,
                bn1_gamma=bn1_gamma, bn1_beta=bn1_beta,
                bn1_mean=bn1_mean, bn1_var=bn1_var,
                bn2_gamma=bn2_gamma, bn2_beta=bn2_beta,
                bn2_mean=bn2_mean, bn2_var=bn2_var)


def _reference_forward(x, params):
    """Pure-JAX f32 reference matching the PyTorch module's eval-mode forward."""
    s1 = params["bn1_gamma"] / jnp.sqrt(params["bn1_var"] + BN_EPS)
    t1 = params["bn1_beta"] - params["bn1_mean"] * s1
    s2 = params["bn2_gamma"] / jnp.sqrt(params["bn2_var"] + BN_EPS)
    t2 = params["bn2_beta"] - params["bn2_mean"] * s2
    h = jnp.maximum(x @ params["w1"] + params["b1"], 0.0) * s1 + t1
    h = jnp.maximum(h @ params["w2"] + params["b2"], 0.0) * s2 + t2
    return h @ params["w3"] + params["b3"]


if __name__ == "__main__":
    key = jax.random.PRNGKey(0)
    k_param, k_x = jax.random.split(key)

    params = init_params(k_param)
    folded = fold_params(params)

    # Small batch (single exact tile) + a batch exercising the 2-tile split and
    # the ragged (partial) last tile.
    for B in (8, 300):
        x = jax.random.normal(jax.random.fold_in(k_x, B), (B, INPUT_DIM), jnp.float32)
        out = jax.block_until_ready(improved_classifier_forward(x, folded))
        ref = _reference_forward(x, params)
        assert out.shape == (B, NUM_CLASSES)
        # bf16 weights/activations/output store (f32 accumulation) vs f32 ref.
        assert jnp.allclose(out, ref, atol=5e-2, rtol=5e-2), (
            f"B={B}: max abs diff {float(jnp.max(jnp.abs(out - ref)))}")

    # TODO(synk): Dropout is identity (eval mode) and BatchNorm uses running stats;
    # training-mode batch statistics / RNG dropout are not implemented in-kernel.
    print("KERNEL_OK")
</pallas_src>

<mosaic_0001>
module attributes {stable_mosaic.version = 11 : i64} {
  func.func @_mlp_kernel(%arg0: i32, %arg1: memref<8x768xf32, #tpu.memory_space<vmem>>, %arg2: memref<768x256xbf16, #tpu.memory_space<vmem>>, %arg3: memref<1x256xf32, #tpu.memory_space<vmem>>, %arg4: memref<256x128xbf16, #tpu.memory_space<vmem>>, %arg5: memref<1x128xf32, #tpu.memory_space<vmem>>, %arg6: memref<128x128xbf16, #tpu.memory_space<vmem>>, %arg7: memref<1x128xf32, #tpu.memory_space<vmem>>, %arg8: memref<8x128xbf16, #tpu.memory_space<vmem>>) attributes {dimension_semantics = [#tpu.dimension_semantics<parallel>], iteration_bounds = array<i64: 1>, scalar_prefetch = 0 : i64, scratch_operands = 0 : i64, tpu.core_type = #tpu.core_type<tc>, window_params = [{transform_indices = @transform_0, window_bounds = array<i64: 8, 768>}, {pipeline_mode = #tpu.pipeline_mode<synchronous>, transform_indices = @transform_1, window_bounds = array<i64: 768, 256>}, {pipeline_mode = #tpu.pipeline_mode<synchronous>, transform_indices = @transform_2, window_bounds = array<i64: 1, 256>}, {pipeline_mode = #tpu.pipeline_mode<synchronous>, transform_indices = @transform_3, window_bounds = array<i64: 256, 128>}, {pipeline_mode = #tpu.pipeline_mode<synchronous>, transform_indices = @transform_4, window_bounds = array<i64: 1, 128>}, {pipeline_mode = #tpu.pipeline_mode<synchronous>, transform_indices = @transform_5, window_bounds = array<i64: 128, 128>}, {pipeline_mode = #tpu.pipeline_mode<synchronous>, transform_indices = @transform_6, window_bounds = array<i64: 1, 128>}, {transform_indices = @transform_7, window_bounds = array<i64: 8, 128>}]} {
    %c0 = arith.constant 0 : index
    %c0_0 = arith.constant 0 : index
    %0 = vector.load %arg1[%c0, %c0_0] : memref<8x768xf32, #tpu.memory_space<vmem>>, vector<8x768xf32>
    %1 = arith.truncf %0 : vector<8x768xf32> to vector<8x768xbf16>
    %c0_1 = arith.constant 0 : index
    %c0_2 = arith.constant 0 : index
    %2 = vector.load %arg2[%c0_1, %c0_2] : memref<768x256xbf16, #tpu.memory_space<vmem>>, vector<768x256xbf16>
    %cst = arith.constant dense<0.000000e+00> : vector<8x256xf32>
    %3 = tpu.matmul %1, %2, %cst {dimension_numbers = #tpu.dot_dimension_numbers<[1], [0], [0], [1], [0, 0, 1, 1], [], []>} : vector<8x768xbf16>, vector<768x256xbf16>, vector<8x256xf32> -> vector<8x256xf32>
    %c0_3 = arith.constant 0 : index
    %c0_4 = arith.constant 0 : index
    %4 = vector.load %arg3[%c0_3, %c0_4] : memref<1x256xf32, #tpu.memory_space<vmem>>, vector<1x256xf32>
    %5 = vector.broadcast %4 : vector<1x256xf32> to vector<8x256xf32>
    %6 = arith.addf %3, %5 : vector<8x256xf32>
    %cst_5 = arith.constant 0.000000e+00 : f32
    %7 = vector.broadcast %cst_5 : f32 to vector<8x256xf32>
    %8 = arith.maximumf %6, %7 : vector<8x256xf32>
    %9 = arith.truncf %8 : vector<8x256xf32> to vector<8x256xbf16>
    %c0_6 = arith.constant 0 : index
    %c0_7 = arith.constant 0 : index
    %10 = vector.load %arg4[%c0_6, %c0_7] : memref<256x128xbf16, #tpu.memory_space<vmem>>, vector<256x128xbf16>
    %cst_8 = arith.constant dense<0.000000e+00> : vector<8x128xf32>
    %11 = tpu.matmul %9, %10, %cst_8 {dimension_numbers = #tpu.dot_dimension_numbers<[1], [0], [0], [1], [0, 0, 1, 1], [], []>} : vector<8x256xbf16>, vector<256x128xbf16>, vector<8x128xf32> -> vector<8x128xf32>
    %c0_9 = arith.constant 0 : index
    %c0_10 = arith.constant 0 : index
    %12 = vector.load %arg5[%c0_9, %c0_10] : memref<1x128xf32, #tpu.memory_space<vmem>>, vector<1x128xf32>
    %13 = vector.broadcast %12 : vector<1x128xf32> to vector<8x128xf32>
    %14 = arith.addf %11, %13 : vector<8x128xf32>
    %cst_11 = arith.constant 0.000000e+00 : f32
    %15 = vector.broadcast %cst_11 : f32 to vector<8x128xf32>
    %16 = arith.maximumf %14, %15 : vector<8x128xf32>
    %17 = arith.truncf %16 : vector<8x128xf32> to vector<8x128xbf16>
    %c0_12 = arith.constant 0 : index
    %c0_13 = arith.constant 0 : index
    %18 = vector.load %arg6[%c0_12, %c0_13] : memref<128x128xbf16, #tpu.memory_space<vmem>>, vector<128x128xbf16>
    %cst_14 = arith.constant dense<0.000000e+00> : vector<8x128xf32>
    %19 = tpu.matmul %17, %18, %cst_14 {dimension_numbers = #tpu.dot_dimension_numbers<[1], [0], [0], [1], [0, 0, 1, 1], [], []>} : vector<8x128xbf16>, vector<128x128xbf16>, vector<8x128xf32> -> vector<8x128xf32>
    %c0_15 = arith.constant 0 : index
    %c0_16 = arith.constant 0 : index
    %20 = vector.load %arg7[%c0_15, %c0_16] : memref<1x128xf32, #tpu.memory_space<vmem>>, vector<1x128xf32>
    %21 = vector.broadcast %20 : vector<1x128xf32> to vector<8x128xf32>
    %22 = arith.addf %19, %21 : vector<8x128xf32>
    %23 = arith.truncf %22 : vector<8x128xf32> to vector<8x128xbf16>
    %c0_17 = arith.constant 0 : index
    %c0_18 = arith.constant 0 : index
    %24 = vector.load %arg8[%c0_17, %c0_18] : memref<8x128xbf16, #tpu.memory_space<vmem>>, vector<8x128xbf16>
    tpu.vector_store %arg8[%c0_17, %c0_18], %23 {strides = array<i32>} : memref<8x128xbf16, #tpu.memory_space<vmem>>, vector<8x128xbf16>,
    return
  }
  func.func @transform_0(%arg0: i32) -> (i32, i32) {
    %c0_i32 = arith.constant 0 : i32
    %c0_i32_0 = arith.constant 0 : i32
    return %arg0, %c0_i32 : i32, i32
  }
  func.func @transform_1(%arg0: i32) -> (i32, i32) {
    %c0_i32 = arith.constant 0 : i32
    %c0_i32_0 = arith.constant 0 : i32
    %c0_i32_1 = arith.constant 0 : i32
    return %c0_i32, %c0_i32_0 : i32, i32
  }
  func.func @transform_2(%arg0: i32) -> (i32, i32) {
    %c0_i32 = arith.constant 0 : i32
    %c0_i32_0 = arith.constant 0 : i32
    %c0_i32_1 = arith.constant 0 : i32
    return %c0_i32, %c0_i32_0 : i32, i32
  }
  func.func @transform_3(%arg0: i32) -> (i32, i32) {
    %c0_i32 = arith.constant 0 : i32
    %c0_i32_0 = arith.constant 0 : i32
    %c0_i32_1 = arith.constant 0 : i32
    return %c0_i32, %c0_i32_0 : i32, i32
  }
  func.func @transform_4(%arg0: i32) -> (i32, i32) {
    %c0_i32 = arith.constant 0 : i32
    %c0_i32_0 = arith.constant 0 : i32
    %c0_i32_1 = arith.constant 0 : i32
    return %c0_i32, %c0_i32_0 : i32, i32
  }
  func.func @transform_5(%arg0: i32) -> (i32, i32) {
    %c0_i32 = arith.constant 0 : i32
    %c0_i32_0 = arith.constant 0 : i32
    %c0_i32_1 = arith.constant 0 : i32
    return %c0_i32, %c0_i32_0 : i32, i32
  }
  func.func @transform_6(%arg0: i32) -> (i32, i32) {
    %c0_i32 = arith.constant 0 : i32
    %c0_i32_0 = arith.constant 0 : i32
    %c0_i32_1 = arith.constant 0 : i32
    return %c0_i32, %c0_i32_0 : i32, i32
  }
  func.func @transform_7(%arg0: i32) -> (i32, i32) {
    %c0_i32 = arith.constant 0 : i32
    %c0_i32_0 = arith.constant 0 : i32
    return %arg0, %c0_i32 : i32, i32
  }
}

</mosaic_0001>

<bundles_post_ra>
// kernel: improved_classifier_forward.1
= control target key start
LH: loop header
LB: loop body
LE: loop exit
PB: predicated region body
PF: predicated region fallthrough
CT: control target
= control target key end

     0   :  { %12 = vsyncpa [#allocation3], 0  ;;  %s1654_s0 = inlined_call_operand.hbm [shape: f32[8,768], index: 0, kind: input, shape index: {}]   ;;  %s1655_s1 = inlined_call_operand.hbm [shape: bf16[768,256], index: 1, kind: input, shape index: {}]   ;;  %s1656_s2 = inlined_call_operand.hbm [shape: f32[1,256], index: 2, kind: input, shape index: {}]   ;;  %s1657_s3 = inlined_call_operand.hbm [shape: bf16[256,128], index: 3, kind: input, shape index: {}]   ;;  %s1658_s4 = inlined_call_operand.vmem [shape: f32[1,128], index: 4, kind: input, shape index: {}]   ;;  %s1659_s5 = inlined_call_operand.hbm [shape: bf16[128,128], index: 5, kind: input, shape index: {}]   ;;  %s1660_s6 = inlined_call_operand.vmem [shape: f32[1,128], index: 6, kind: input, shape index: {}]   ;;  %s1661_s7 = inlined_call_operand.vmem [shape: bf16[8,128], index: 7, kind: output, shape index: {}]  }
   0x1   :  { %13 = vsyncpa [#allocation5], 0 }
   0x2   :  { %14 = vsyncpa [#allocation8], 0  ;;  %s1573_s24 = smov [#allocation4]  }
   0x3   :  { %s30_s25 = sshll.u32 %s1573_s24, 4  ;;  %s31_s25 = int_to_ptr.vmem [resolvable:$true] %s30_s25 }
   0x4   :  { %s1475_s26 = scalar_lea.vmem %s31_s25, 12288  ;;  %p1480_p1 = scmp.lt.s32.totalorder %s31_s25, %s31_s25 }
   0x5   :  { %p1476_p0 = scmp.ne.s32.totalorder %s31_s25, %s1475_s26  ;;  %p1481_p2 = scmp.lt.s32.totalorder %s1475_s26, %s1475_s26 }
   0x7   :  { %p1482_p3 = por %p1481_p2, %p1480_p1 }
   0x9   :  { %p1483_p4 = pnand %p1482_p3, %p1476_p0 }
   0xb   :  { %1486 = shalt.err (!%p1483_p4)
}
   0xc   :  { %s1574_s27 = smov 128   ;;  %s1575_s28 = smov 8  }
   0xd   :  { %36 = dma.hbm_to_vmem [thread:$0]  %s1655_s1, 12288, %s31_s25, [#allocation5], %s1574_s27, %s1574_s27, %s1575_s28  }
   0xe   :  { %s1576_s8 = smov [#allocation7]  }
   0xf   :  { %s52_s9 = sshll.u32 %s1576_s8, 4  ;;  %s53_s9 = int_to_ptr.vmem [resolvable:$true] %s52_s9 }
  0x10   :  { %s1495_s10 = scalar_lea.vmem %s53_s9, 2048  ;;  %p1500_p6 = scmp.lt.s32.totalorder %s53_s9, %s53_s9 }
  0x11   :  { %p1496_p5 = scmp.ne.s32.totalorder %s53_s9, %s1495_s10  ;;  %p1501_p7 = scmp.lt.s32.totalorder %s1495_s10, %s1495_s10 }
  0x13   :  { %p1502_p8 = por %p1501_p7, %p1500_p6 }
  0x15   :  { %p1503_p9 = pnand %p1502_p8, %p1496_p5 }
  0x17   :  { %1506 = shalt.err (!%p1503_p9)
}
  0x18   :  { %s1577_s11 = smov 64   ;;  %s1578_s12 = smov 4  }
  0x19   :  { %58 = dma.hbm_to_vmem [thread:$0]  %s1657_s3, 2048, %s53_s9, [#allocation8], %s1577_s11, %s1577_s11, %s1578_s12  }
  0x1a   :  { %s1579_s1 = smov [#allocation2]   ;;  %s1580_s16 = smov [#allocation6]  }
  0x1b   :  { %s21_s15 = sshll.u32 %s1579_s1, 4  ;;  %s43_s17 = sshll.u32 %s1580_s16, 4  ;;  %s22_s15 = int_to_ptr.vmem [resolvable:$true] %s21_s15  ;;  %s44_s17 = int_to_ptr.vmem [resolvable:$true] %s43_s17 }
  0x1c   :  { %s1515_s18 = scalar_lea.vmem %s22_s15, 768  ;;  %p1520_p11 = scmp.lt.s32.totalorder %s22_s15, %s22_s15 }
  0x1d   :  { %p1516_p10 = scmp.ne.s32.totalorder %s22_s15, %s1515_s18  ;;  %p1521_p12 = scmp.lt.s32.totalorder %s1515_s18, %s1515_s18 }
  0x1f   :  { %p1522_p13 = por %p1521_p12, %p1520_p11 }
  0x21   :  { %p1523_p0 = pnand %p1522_p13, %p1516_p10 }
  0x23   :  { %1526 = shalt.err (!%p1523_p0)
}
  0x24   :  { %24 = dma.hbm_to_vmem [thread:$0]  %s1654_s0, 768, %s22_s15, [#allocation3]  }
  0x25   :  { %s1535_s21 = scalar_lea.vmem %s44_s17, 32  ;;  %p1540_p2 = scmp.lt.s32.totalorder %s44_s17, %s44_s17 }
  0x26   :  { %p1536_p1 = scmp.ne.s32.totalorder %s44_s17, %s1535_s21  ;;  %p1541_p3 = scmp.lt.s32.totalorder %s1535_s21, %s1535_s21 }
  0x28   :  { %p1542_p4 = por %p1541_p3, %p1540_p2 }
  0x2a   :  { %p1543_p5 = pnand %p1542_p4, %p1536_p1 }
  0x2c   :  { %1546 = shalt.err (!%p1543_p5)
}
  0x2d   :  { %46 = dma.hbm_to_vmem [thread:$0]  %s1656_s2, 32, %s44_s17, [#allocation5]  }
  0x2e   :  { %s1581_s23 = smov [#allocation9]  }
  0x2f   :  { %s66_s24 = sshll.u32 %s1581_s23, 4  ;;  %s67_s24 = int_to_ptr.vmem [resolvable:$true] %s66_s24 }
  0x30   :  { %s1555_s25 = scalar_lea.vmem %s67_s24, 1024  ;;  %p1560_p7 = scmp.lt.s32.totalorder %s67_s24, %s67_s24 }
  0x31   :  { %p1556_p6 = scmp.ne.s32.totalorder %s67_s24, %s1555_s25  ;;  %p1561_p8 = scmp.lt.s32.totalorder %s1555_s25, %s1555_s25 }
  0x33   :  { %p1562_p9 = por %p1561_p8, %p1560_p7 }
  0x35   :  { %p1563_p10 = pnand %p1562_p9, %p1556_p6 }
  0x37   :  { %1566 = shalt.err (!%p1563_p10)
}
  0x38   :  { %72 = dma.hbm_to_vmem [thread:$0]  %s1659_s5, 1024, %s67_s24, [#allocation8], %s1577_s11, %s1577_s11, %s1578_s12  }
  0x39   :  { %1567 = dma.done.wait [#allocation3], 768  }
  0x3a   :  { %1568 = vsyncadd [#allocation3], 4294966528 }
  0x3b   :  { %1569 = dma.done.wait [#allocation5], 12320  }
  0x3c   :  { %1570 = vsyncadd [#allocation5], 4294954976 }
  0x3d   :  { %1571 = dma.done.wait [#allocation8], 3072  }
  0x3e   :  { %1572 = vsyncadd [#allocation8], 4294964224  ;;  %v1299_v0 = vld [vmem:[#allocation4 + $0x74] ss:$8 sps:$4 sm:$0xff]   ;;  %v1301_v1 = vld [vmem:[#allocation4 + $0x70] ss:$8 sps:$4 sm:$0xff]  }
  0x3f   :  { %691 = vmatprep.subr.bf16.mxu0 %v1299_v0  ;;  %v1302_v2 = vld [vmem:[#allocation4 + $0x174] ss:$8 sps:$4 sm:$0xff]   ;;  %v1304_v3 = vld [vmem:[#allocation4 + $0x170] ss:$8 sps:$4 sm:$0xff]   ;;  %v1305_v4 = vld [vmem:[#allocation4 + $0x64] ss:$8 sps:$4 sm:$0xff]  }
  0x40   :  { %692 = vmatpush1.bf16.msra.mxu0 %v1301_v1  ;;  %v1307_v5 = vld [vmem:[#allocation4 + $0x60] ss:$8 sps:$4 sm:$0xff]   ;;  %732 = vmatprep.subr.bf16.mxu1 %v1302_v2  ;;  %v1308_v6 = vld [vmem:[#allocation4 + $0x164] ss:$8 sps:$4 sm:$0xff]   ;;  %v1311_v8 = vld [vmem:[#allocation4 + $0x54] ss:$8 sps:$4 sm:$0xff]  }
  0x41   :  { %733 = vmatpush1.bf16.msra.mxu1 %v1304_v3  ;;  %693 = vmatprep.subr.bf16.mxu0 %v1305_v4  ;;  %v1310_v7 = vld [vmem:[#allocation4 + $0x160] ss:$8 sps:$4 sm:$0xff]   ;;  %v1313_v9 = vld [vmem:[#allocation4 + $0x50] ss:$8 sps:$4 sm:$0xff]   ;;  %v1314_v10 = vld [vmem:[#allocation4 + $0x154] ss:$8 sps:$4 sm:$0xff]  }
  0x42   :  { %734 = vmatprep.subr.bf16.mxu1 %v1308_v6  ;;  %v1317_v11 = vld [vmem:[#allocation4 + $0x44] ss:$8 sps:$4 sm:$0xff]   ;;  %v1316_v12 = vld [vmem:[#allocation4 + $0x150] ss:$8 sps:$4 sm:$0xff]   ;;  %v1319_v14 = vld [vmem:[#allocation4 + $0x40] ss:$8 sps:$4 sm:$0xff]  }
  0x43   :  { %v1320_v13 = vld [vmem:[#allocation4 + $0x144] ss:$8 sps:$4 sm:$0xff]   ;;  %v1323_v15 = vld [vmem:[#allocation4 + $0x34] ss:$8 sps:$4 sm:$0xff]   ;;  %v1322_v16 = vld [vmem:[#allocation4 + $0x140] ss:$8 sps:$4 sm:$0xff]  }
  0x44   :  { %694 = vmatpush1.bf16.msra.mxu0 %v1307_v5  ;;  %v1326_v17 = vld [vmem:[#allocation4 + $0x134] ss:$8 sps:$4 sm:$0xff]   ;;  %v1325_v18 = vld [vmem:[#allocation4 + $0x30] ss:$8 sps:$4 sm:$0xff]   ;;  %v1329_v19 = vld [vmem:[#allocation4 + $0x24] ss:$8 sps:$4 sm:$0xff]  }
  0x45   :  { %695 = vmatprep.subr.bf16.mxu0 %v1311_v8  ;;  %735 = vmatpush1.bf16.msra.mxu1 %v1310_v7  ;;  %v1328_v20 = vld [vmem:[#allocation4 + $0x130] ss:$8 sps:$4 sm:$0xff]   ;;  %v1332_v21 = vld [vmem:[#allocation4 + $0x124] ss:$8 sps:$4 sm:$0xff]   ;;  %v1331_v22 = vld [vmem:[#allocation4 + $0x20] ss:$8 sps:$4 sm:$0xff]  }
  0x46   :  { %736 = vmatprep.subr.bf16.mxu1 %v1314_v10  ;;  %v1335_v23 = vld [vmem:[#allocation4 + $0x14] ss:$8 sps:$4 sm:$0xff]   ;;  %v1334_v24 = vld [vmem:[#allocation4 + $0x120] ss:$8 sps:$4 sm:$0xff]   ;;  %v1337_v26 = vld [vmem:[#allocation4 + $0x10] ss:$8 sps:$4 sm:$0xff]  }
  0x47   :  { %v1338_v25 = vld [vmem:[#allocation4 + $0x114] ss:$8 sps:$4 sm:$0xff]   ;;  %v1341_v27 = vld [vmem:[#allocation4 + $0x4] ss:$8 sps:$4 sm:$0xff]   ;;  %v1340_v28 = vld [vmem:[#allocation4 + $0x110] ss:$8 sps:$4 sm:$0xff]  }
  0x48   :  { %696 = vmatpush1.bf16.msra.mxu0 %v1313_v9  ;;  %v1344_v29 = vld [vmem:[#allocation4 + $0x104] ss:$8 sps:$4 sm:$0xff]   ;;  %v1343_v30 = vld [vmem:[#allocation4] ss:$8 sps:$4 sm:$0xff]   ;;  %v1347_v31 = vld [vmem:[#allocation4 + $0xf4] ss:$8 sps:$4 sm:$0xff]  }
  0x49   :  { %697 = vmatprep.subr.bf16.mxu0 %v1317_v11  ;;  %737 = vmatpush1.bf16.msra.mxu1 %v1316_v12  ;;  %v1346_v32 = vld [vmem:[#allocation4 + $0x100] ss:$8 sps:$4 sm:$0xff]   ;;  %v1350_v33 = vld [vmem:[#allocation4 + $0x1f4] ss:$8 sps:$4 sm:$0xff]   ;;  %v1349_v34 = vld [vmem:[#allocation4 + $0xf0] ss:$8 sps:$4 sm:$0xff]  }
  0x4a   :  { %738 = vmatprep.subr.bf16.mxu1 %v1320_v13  ;;  %v1353_v35 = vld [vmem:[#allocation4 + $0xe4] ss:$8 sps:$4 sm:$0xff]   ;;  %v1352_v36 = vld [vmem:[#allocation4 + $0x1f0] ss:$8 sps:$4 sm:$0xff]   ;;  %v1355_v38 = vld [vmem:[#allocation4 + $0xe0] ss:$8 sps:$4 sm:$0xff]  }
  0x4b   :  { %v1356_v37 = vld [vmem:[#allocation4 + $0x1e4] ss:$8 sps:$4 sm:$0xff]   ;;  %v1359_v39 = vld [vmem:[#allocation4 + $0xd4] ss:$8 sps:$4 sm:$0xff]   ;;  %v1358_v40 = vld [vmem:[#allocation4 + $0x1e0] ss:$8 sps:$4 sm:$0xff]  }
  0x4c   :  { %698 = vmatpush1.bf16.msra.mxu0 %v1319_v14  ;;  %v1362_v41 = vld [vmem:[#allocation4 + $0x1d4] ss:$8 sps:$4 sm:$0xff]   ;;  %v1361_v42 = vld [vmem:[#allocation4 + $0xd0] ss:$8 sps:$4 sm:$0xff]   ;;  %v1365_v43 = vld [vmem:[#allocation4 + $0xc4] ss:$8 sps:$4 sm:$0xff]  }
  0x4d   :  { %699 = vmatprep.subr.bf16.mxu0 %v1323_v15  ;;  %739 = vmatpush1.bf16.msra.mxu1 %v1322_v16  ;;  %v1364_v44 = vld [vmem:[#allocation4 + $0x1d0] ss:$8 sps:$4 sm:$0xff]   ;;  %v1368_v45 = vld [vmem:[#allocation4 + $0x1c4] ss:$8 sps:$4 sm:$0xff]   ;;  %v1367_v47 = vld [vmem:[#allocation4 + $0xc0] ss:$8 sps:$4 sm:$0xff]  }
  0x4e   :  { %740 = vmatprep.subr.bf16.mxu1 %v1326_v17  ;;  %v92_v46 = vld [vmem:[#allocation2 + $0x8] sm:$0xff]  ;;  %v94_v50 = vld [vmem:[#allocation2 + $0x18] sm:$0xff]  ;;  %v91_v4 = vld [vmem:[#allocation2] sm:$0xff]  ;;  %vm1583_vm0 = vmmov 0  }
  0x4f   :  { %v98_v48 = vpack.c.bf16 %v92_v46, %v92_v46  ;;  %v1371_v49 = vld [vmem:[#allocation4 + $0xb4] ss:$8 sps:$4 sm:$0xff]   ;;  %v1370_v51 = vld [vmem:[#allocation4 + $0x1c0] ss:$8 sps:$4 sm:$0xff]   ;;  %v100_v52 = vpack.c.bf16 %v94_v50, %v94_v50  ;;  %v1373_v54 = vld [vmem:[#allocation4 + $0xb0] ss:$8 sps:$4 sm:$0xff]   ;;  %v97_v7 = vpack.c.bf16 %v91_v4, %v91_v4 }
  0x50   :  { %700 = vmatpush1.bf16.msra.mxu0 %v1325_v18  ;;  %v1374_v53 = vld [vmem:[#allocation4 + $0x1b4] ss:$8 sps:$4 sm:$0xff]   ;;  %v1377_v55 = vld [vmem:[#allocation4 + $0xa4] ss:$8 sps:$4 sm:$0xff]   ;;  %v1376_v56 = vld [vmem:[#allocation4 + $0x1b0] ss:$8 sps:$4 sm:$0xff]  }
  0x51   :  { %701 = vmatprep.subr.bf16.mxu0 %v1329_v19  ;;  %741 = vmatpush1.bf16.msra.mxu1 %v1328_v20  ;;  %v1380_v57 = vld [vmem:[#allocation4 + $0x1a4] ss:$8 sps:$4 sm:$0xff]   ;;  %v1379_v58 = vld [vmem:[#allocation4 + $0xa0] ss:$8 sps:$4 sm:$0xff]   ;;  %v1383_v59 = vld [vmem:[#allocation4 + $0x94] ss:$8 sps:$4 sm:$0xff]  }
  0x52   :  { %742 = vmatprep.subr.bf16.mxu1 %v1332_v21  ;;  %723 = vmatprep.mubr.bf16.mxu0 %v98_v48  ;;  %v1382_v60 = vld [vmem:[#allocation4 + $0x1a0] ss:$8 sps:$4 sm:$0xff]   ;;  %v1386_v61 = vld [vmem:[#allocation4 + $0x194] ss:$8 sps:$4 sm:$0xff]   ;;  %v1385_v62 = vld [vmem:[#allocation4 + $0x90] ss:$8 sps:$4 sm:$0xff]  }
  0x53   :  { %764 = vmatprep.mubr.bf16.mxu1 %v100_v52  ;;  %v1389_v63 = vld [vmem:[#allocation4 + $0x84] ss:$8 sps:$4 sm:$0xff]   ;;  %v1388_v0 = vld [vmem:[#allocation4 + $0x190] ss:$8 sps:$4 sm:$0xff]   ;;  %v1391_v1 = vld [vmem:[#allocation4 + $0x80] ss:$8 sps:$4 sm:$0xff]  }
  0x54   :  { %702 = vmatpush1.bf16.msra.mxu0 %v1331_v22  ;;  %v1392_v2 = vld [vmem:[#allocation4 + $0x184] ss:$8 sps:$4 sm:$0xff]   ;;  %v1394_v3 = vld [vmem:[#allocation4 + $0x180] ss:$8 sps:$4 sm:$0xff]   ;;  %v1397_v5 = vld [vmem:[#allocation4 + $0x274] ss:$8 sps:$4 sm:$0xff]  }
  0x55   :  { %703 = vmatprep.subr.bf16.mxu0 %v1335_v23  ;;  %743 = vmatpush1.bf16.msra.mxu1 %v1334_v24  ;;  %v93_v6 = vld [vmem:[#allocation2 + $0x10] sm:$0xff]  ;;  %v1395_v8 = vld [vmem:[#allocation4 + $0x270] ss:$8 sps:$4 sm:$0xff]   ;;  %v1403_v13 = vld [vmem:[#allocation4 + $0x254] ss:$8 sps:$4 sm:$0xff]  }
  0x56   :  { %744 = vmatprep.subr.bf16.mxu1 %v1338_v25  ;;  %v99_v9 = vpack.c.bf16 %v93_v6, %v93_v6  ;;  %v1400_v10 = vld [vmem:[#allocation4 + $0x264] ss:$8 sps:$4 sm:$0xff]   ;;  %v1398_v11 = vld [vmem:[#allocation4 + $0x260] ss:$8 sps:$4 sm:$0xff]   ;;  %v96_v12 = vld [vmem:[#allocation2 + $0x28] sm:$0xff] }
  0x57   :  { %v102_v14 = vpack.c.bf16 %v96_v12, %v96_v12  ;;  %v1401_v15 = vld [vmem:[#allocation4 + $0x250] ss:$8 sps:$4 sm:$0xff]   ;;  %v1406_v16 = vld [vmem:[#allocation4 + $0x244] ss:$8 sps:$4 sm:$0xff]   ;;  %v1404_v17 = vld [vmem:[#allocation4 + $0x240] ss:$8 sps:$4 sm:$0xff]  }
  0x58   :  { %704 = vmatpush1.bf16.msra.mxu0 %v1337_v26  ;;  %v1409_v18 = vld [vmem:[#allocation4 + $0x234] ss:$8 sps:$4 sm:$0xff]   ;;  %v1407_v19 = vld [vmem:[#allocation4 + $0x230] ss:$8 sps:$4 sm:$0xff]   ;;  %v1412_v20 = vld [vmem:[#allocation4 + $0x224] ss:$8 sps:$4 sm:$0xff]  }
  0x59   :  { %705 = vmatprep.subr.bf16.mxu0 %v1341_v27  ;;  %745 = vmatpush1.bf16.msra.mxu1 %v1340_v28  ;;  %v1410_v21 = vld [vmem:[#allocation4 + $0x220] ss:$8 sps:$4 sm:$0xff]   ;;  %v1415_v22 = vld [vmem:[#allocation4 + $0x214] ss:$8 sps:$4 sm:$0xff]   ;;  %v1413_v23 = vld [vmem:[#allocation4 + $0x210] ss:$8 sps:$4 sm:$0xff]  }
  0x5a   :  { %746 = vmatprep.subr.bf16.mxu1 %v1344_v29  ;;  %v1418_v24 = vld [vmem:[#allocation4 + $0x204] ss:$8 sps:$4 sm:$0xff]   ;;  %v1416_v25 = vld [vmem:[#allocation4 + $0x200] ss:$8 sps:$4 sm:$0xff]   ;;  %v1421_v26 = vld [vmem:[#allocation4 + $0x2f4] ss:$8 sps:$4 sm:$0xff]  }
  0x5b   :  { %v1419_v27 = vld [vmem:[#allocation4 + $0x2f0] ss:$8 sps:$4 sm:$0xff]   ;;  %v1424_v28 = vld [vmem:[#allocation4 + $0x2e4] ss:$8 sps:$4 sm:$0xff]   ;;  %v1422_v29 = vld [vmem:[#allocation4 + $0x2e0] ss:$8 sps:$4 sm:$0xff]  }
  0x5c   :  { %706 = vmatpush1.bf16.msra.mxu0 %v1343_v30  ;;  %v1427_v30 = vld [vmem:[#allocation4 + $0x2d4] ss:$8 sps:$4 sm:$0xff]   ;;  %v1447_v48 = vld [vmem:[#allocation7 + $0x68] sm:$0xff]   ;;  %v1449_v50 = vld [vmem:[#allocation7 + $0x60] sm:$0xff]  }
  0x5d   :  { %707 = vmatprep.subr.bf16.mxu0 %v1347_v31  ;;  %747 = vmatpush1.bf16.msra.mxu1 %v1346_v32  ;;  %v1425_v31 = vld [vmem:[#allocation4 + $0x2d0] ss:$8 sps:$4 sm:$0xff]   ;;  %v1430_v32 = vld [vmem:[#allocation4 + $0x2c4] ss:$8 sps:$4 sm:$0xff]  }
  0x5e   :  { %748 = vmatprep.subr.bf16.mxu1 %v1350_v33  ;;  %v1428_v33 = vld [vmem:[#allocation4 + $0x2c0] ss:$8 sps:$4 sm:$0xff]   ;;  %v1445_v46 = vld [vmem:[#allocation7 + $0x70] sm:$0xff]  }
  0x5f   :  { %v1451_v52 = vld [vmem:[#allocation7 + $0x58] sm:$0xff]  }
  0x60   :  { %708 = vmatpush2.bf16.msra.mxu0 %v1349_v34  ;;  %v1433_v34 = vld [vmem:[#allocation4 + $0x2b4] ss:$8 sps:$4 sm:$0xff]  }
  0x61   :  { %709 = vmatprep.subr.bf16.mxu0 %v1353_v35  ;;  %749 = vmatpush2.bf16.msra.mxu1 %v1352_v36  ;;  %v1431_v35 = vld [vmem:[#allocation4 + $0x2b0] ss:$8 sps:$4 sm:$0xff]   ;;  %v1436_v36 = vld [vmem:[#allocation4 + $0x2a4] ss:$8 sps:$4 sm:$0xff]  }
  0x62   :  { %750 = vmatprep.subr.bf16.mxu1 %v1356_v37  ;;  %v1434_v37 = vld [vmem:[#allocation4 + $0x2a0] ss:$8 sps:$4 sm:$0xff]  }
  0x64   :  { %710 = vmatpush2.bf16.msra.mxu0 %v1355_v38  ;;  %v1439_v38 = vld [vmem:[#allocation4 + $0x294] ss:$8 sps:$4 sm:$0xff]  }
  0x65   :  { %711 = vmatprep.subr.bf16.mxu0 %v1359_v39  ;;  %751 = vmatpush2.bf16.msra.mxu1 %v1358_v40  ;;  %v1437_v39 = vld [vmem:[#allocation4 + $0x290] ss:$8 sps:$4 sm:$0xff]   ;;  %v1442_v40 = vld [vmem:[#allocation4 + $0x284] ss:$8 sps:$4 sm:$0xff]  }
  0x66   :  { %752 = vmatprep.subr.bf16.mxu1 %v1362_v41  ;;  %v1440_v41 = vld [vmem:[#allocation4 + $0x280] ss:$8 sps:$4 sm:$0xff]  }
  0x68   :  { %712 = vmatpush2.bf16.msra.mxu0 %v1361_v42  ;;  %v95_v42 = vld [vmem:[#allocation2 + $0x20] sm:$0xff] }
  0x69   :  { %713 = vmatprep.subr.bf16.mxu0 %v1365_v43  ;;  %753 = vmatpush2.bf16.msra.mxu1 %v1364_v44  ;;  %v101_v43 = vpack.c.bf16 %v95_v42, %v95_v42  ;;  %v1443_v44 = vld [vmem:[#allocation7 + $0x78] sm:$0xff]  }
  0x6a   :  { %754 = vmatprep.subr.bf16.mxu1 %v1368_v45  ;;  %v1444_v45 = vld [vmem:[#allocation7 + $0x38] sm:$0xff]  }
  0x6c   :  { %714 = vmatpush2.bf16.msra.mxu0 %v1367_v47  ;;  %v1446_v47 = vld [vmem:[#allocation7 + $0x30] sm:$0xff]  }
  0x6d   :  { %715 = vmatprep.subr.bf16.mxu0 %v1371_v49  ;;  %755 = vmatpush2.bf16.msra.mxu1 %v1370_v51  ;;  %v1448_v49 = vld [vmem:[#allocation7 + $0x28] sm:$0xff]   ;;  %v1450_v51 = vld [vmem:[#allocation7 + $0x20] sm:$0xff]  }
  0x6e   :  { %756 = vmatprep.subr.bf16.mxu1 %v1374_v53  ;;  %v1452_v53 = vld [vmem:[#allocation7 + $0x18] sm:$0xff]  }
  0x70   :  { %716 = vmatpush2.bf16.msra.mxu0 %v1373_v54  ;;  %v1453_v54 = vld [vmem:[#allocation7 + $0x50] sm:$0xff]  }
  0x71   :  { %717 = vmatprep.subr.bf16.mxu0 %v1377_v55  ;;  %757 = vmatpush2.bf16.msra.mxu1 %v1376_v56  ;;  %v1454_v55 = vld [vmem:[#allocation7 + $0x10] sm:$0xff]   ;;  %v1455_v56 = vld [vmem:[#allocation7 + $0x48] sm:$0xff]  }
  0x72   :  { %758 = vmatprep.subr.bf16.mxu1 %v1380_v57  ;;  %v1456_v57 = vld [vmem:[#allocation7 + $0x8] sm:$0xff]  }
  0x74   :  { %718 = vmatpush2.bf16.msra.mxu0 %v1379_v58  ;;  %v1457_v58 = vld [vmem:[#allocation7 + $0x40] sm:$0xff]  }
  0x75   :  { %719 = vmatprep.subr.bf16.mxu0 %v1383_v59  ;;  %759 = vmatpush2.bf16.msra.mxu1 %v1382_v60  ;;  %v1458_v59 = vld [vmem:[#allocation7] sm:$0xff]   ;;  %v1582_v60 = vmov 0.0  }
  0x76   :  { %760 = vmatprep.subr.bf16.mxu1 %v1386_v61 }
  0x78   :  { %720 = vmatpush2.bf16.msra.mxu0 %v1385_v62 }
  0x79   :  { %721 = vmatprep.subr.bf16.mxu0 %v1389_v63  ;;  %761 = vmatpush2.bf16.msra.mxu1 %v1388_v0 }
  0x7a   :  { %762 = vmatprep.subr.bf16.mxu1 %v1392_v2 }
  0x7c   :  { %722 = vmatpush2.bf16.msra.mxu0 %v1391_v1 }
  0x7d   :  { %773 = vmatprep.subr.bf16.mxu0 %v1397_v5  ;;  %763 = vmatpush2.bf16.msra.mxu1 %v1394_v3  ;;  %v201_v5 = vlaneseq }
  0x7e   :  { %1237 = vmatprep.subr.bf16.mxu1 %v1443_v44 }
  0x7f   :  { %724 = vmatmul.mubr.bf16.vlgmr.msra.gmra.mxu0 %v97_v7  ;;  %v202_v6 = vshrl.u32 %v201_v5, 7 }
  0x80   :  { %774 = vmatpush1.bf16.msra.mxu0 %v1395_v8  ;;  %765 = vmatmul.mubr.bf16.vlgmr.msra.gmra.mxu1 %v99_v9  ;;  %v199_v8 = vld [vmem:[#allocation6] sm:$0x3] }
  0x81   :  { %775 = vmatprep.subr.bf16.mxu0 %v1400_v10  ;;  %805 = vmatprep.mubr.bf16.mxu0 %v102_v14  ;;  %v203_v7 = vsub.s32 0, %v202_v6  ;;  %v207_v9 = vsub.s32 1, %v202_v6 }
  0x82   :  { %1238 = vmatpush3.bf16.msra.mxu1 %v1444_v45 }
  0x83   :  { %1239 = vmatprep.subr.bf16.mxu1 %v1445_v46  ;;  %v204_v10 = vrot.slane %v199_v8, %v203_v7 }
  0x84   :  { %776 = vmatpush1.bf16.msra.mxu0 %v1398_v11  ;;  %v208_v11 = vrot.slane %v199_v8, %v207_v9 }
  0x85   :  { %777 = vmatprep.subr.bf16.mxu0 %v1403_v13 }
  0x86   :  { %1240 = vmatpush3.bf16.msra.mxu1 %v1446_v47 }
  0x87   :  { %1241 = vmatprep.subr.bf16.mxu1 %v1447_v48 }
  0x88   :  { %778 = vmatpush1.bf16.msra.mxu0 %v1401_v15 }
  0x89   :  { %779 = vmatprep.subr.bf16.mxu0 %v1406_v16 }
  0x8a   :  { %1242 = vmatpush3.bf16.msra.mxu1 %v1448_v49 }
  0x8b   :  { %1243 = vmatprep.subr.bf16.mxu1 %v1449_v50 }
  0x8c   :  { %780 = vmatpush1.bf16.msra.mxu0 %v1404_v17 }
  0x8d   :  { %781 = vmatprep.subr.bf16.mxu0 %v1409_v18 }
  0x8e   :  { %1244 = vmatpush3.bf16.msra.mxu1 %v1450_v51 }
  0x8f   :  { %1245 = vmatprep.subr.bf16.mxu1 %v1451_v52 }
  0x90   :  { %782 = vmatpush1.bf16.msra.mxu0 %v1407_v19 }
  0x91   :  { %783 = vmatprep.subr.bf16.mxu0 %v1412_v20 }
  0x92   :  { %1246 = vmatpush3.bf16.msra.mxu1 %v1452_v53 }
  0x93   :  { %1247 = vmatprep.subr.bf16.mxu1 %v1453_v54 }
  0x94   :  { %784 = vmatpush1.bf16.msra.mxu0 %v1410_v21 }
  0x95   :  { %785 = vmatprep.subr.bf16.mxu0 %v1415_v22 }
  0x96   :  { %1248 = vmatpush3.bf16.msra.mxu1 %v1454_v55 }
  0x97   :  { %1249 = vmatprep.subr.bf16.mxu1 %v1455_v56 }
  0x98   :  { %786 = vmatpush1.bf16.msra.mxu0 %v1413_v23 }
  0x99   :  { %787 = vmatprep.subr.bf16.mxu0 %v1418_v24 }
  0x9a   :  { %1250 = vmatpush3.bf16.msra.mxu1 %v1456_v57 }
  0x9b   :  { %1251 = vmatprep.subr.bf16.mxu1 %v1457_v58 }
  0x9c   :  { %788 = vmatpush1.bf16.msra.mxu0 %v1416_v25  ;;  %v1459_v25 = vld [vmem:[#allocation9 + $0x38] sm:$0xff]  }
  0x9d   :  { %789 = vmatprep.subr.bf16.mxu0 %v1421_v26 }
  0x9e   :  { %1252 = vmatpush3.bf16.msra.mxu1 %v1458_v59 }
  0x9f   :  { %1268 = vmatprep.subr.bf16.mxu1 %v1582_v60 }
  0xa0   :  { %790 = vmatpush2.bf16.msra.mxu0 %v1419_v27  ;;  %v1460_v27 = vld [vmem:[#allocation9 + $0x30] sm:$0xff]  }
  0xa1   :  { %791 = vmatprep.subr.bf16.mxu0 %v1424_v28  ;;  %v1461_v28 = vld [vmem:[#allocation9 + $0x28] sm:$0xff]  }
  0xa4   :  { %792 = vmatpush2.bf16.msra.mxu0 %v1422_v29  ;;  %v1462_v29 = vld [vmem:[#allocation9 + $0x20] sm:$0xff]  }
  0xa5   :  { %793 = vmatprep.subr.bf16.mxu0 %v1427_v30  ;;  %v1463_v30 = vld [vmem:[#allocation9 + $0x18] sm:$0xff]  }
  0xa8   :  { %794 = vmatpush2.bf16.msra.mxu0 %v1425_v31  ;;  %v1464_v31 = vld [vmem:[#allocation9 + $0x10] sm:$0xff]  }
  0xa9   :  { %795 = vmatprep.subr.bf16.mxu0 %v1430_v32  ;;  %v1465_v32 = vld [vmem:[#allocation9 + $0x8] sm:$0xff]  }
  0xac   :  { %796 = vmatpush2.bf16.msra.mxu0 %v1428_v33  ;;  %v1466_v33 = vld [vmem:[#allocation9] sm:$0xff]  }
  0xad   :  { %797 = vmatprep.subr.bf16.mxu0 %v1433_v34 }
  0xb0   :  { %798 = vmatpush2.bf16.msra.mxu0 %v1431_v35  ;;  %v1211_v35 = vld [vmem:[%s1658_s4] ss:$0 sm:$0xff] }
  0xb1   :  { %799 = vmatprep.subr.bf16.mxu0 %v1436_v36 }
  0xb4   :  { %800 = vmatpush2.bf16.msra.mxu0 %v1434_v37 }
  0xb5   :  { %801 = vmatprep.subr.bf16.mxu0 %v1439_v38 }
  0xb8   :  { %802 = vmatpush2.bf16.msra.mxu0 %v1437_v39 }
  0xb9   :  { %803 = vmatprep.subr.bf16.mxu0 %v1442_v40 }
  0xbc   :  { %804 = vmatpush2.bf16.msra.mxu0 %v1440_v41 }
  0xbf   :  { %806 = vmatmul.mubr.bf16.vlgmr.msra.gmra.mxu0 %v101_v43  ;;  %v1228_v43 = vld [vmem:[%s1660_s6] ss:$0 sm:$0xff] }
 0x13f   :  { %v725_v61 = vpop.f32.mrf.mxu0 }
 0x140   :  { %v766_v63 = vpop.f32.mrf.mxu1  ;;  %v726_v12 = vadd.f32 %v725_v61, %v204_v10 }
 0x141   :  { %v727_v62 = vpop.f32.mrf.mxu0 }
 0x142   :  { %v768_v1 = vpop.f32.mrf.mxu1  ;;  %v728_v13 = vadd.f32 %v727_v62, %v208_v11  ;;  %v767_v14 = vadd.f32 %v766_v63, %v726_v12 }
 0x143   :  { %v729_v0 = vpop.f32.mrf.mxu0 }
 0x144   :  { %v770_v3 = vpop.f32.mrf.mxu1  ;;  %v769_v16 = vadd.f32 %v768_v1, %v728_v13 }
 0x145   :  { %v730_v2 = vpop.f32.mrf.mxu0 }
 0x146   :  { %v771_v4 = vpop.f32.mrf.mxu1 }
 0x17f   :  { %v807_v15 = vpop.f32.mrf.mxu0 }
 0x180   :  { %v808_v17 = vadd.f32 %v807_v15, %v767_v14 }
 0x181   :  { %v809_v18 = vpop.f32.mrf.mxu0 }
 0x182   :  { %v810_v19 = vadd.f32 %v809_v18, %v769_v16  ;;  %v814_v20 = vmax.f32 %v808_v17, 0.0 }
 0x183   :  { %v811_v21 = vpop.f32.mrf.mxu0 }
 0x184   :  { %v815_v22 = vmax.f32 %v810_v19, 0.0  ;;  %v816_v26 = vpack.c.bf16 %v814_v20, %v814_v20 }
 0x185   :  { %v812_v23 = vpop.f32.mrf.mxu0 }
 0x186   :  { %v817_v24 = vpack.c.bf16 %v815_v22, %v815_v22 }
 0x188   :  { %985 = vmatprep.mubr.bf16.mxu1 %v817_v24 }
 0x189   :  { %986 = vmatmul.mubr.bf16.vlgmr.msra.gmra.mxu1 %v816_v26 }
 0x18a   :  { %1269 = vmatpush3.bf16.msra.mxu1 %v1459_v25  ;;  %1284 = vmatprep.mubr.msk.bf16.mxu1 %vm1583_vm0, %v1582_v60 }
 0x18b   :  { %1270 = vmatprep.subr.bf16.mxu1 %v1582_v60 }
 0x18e   :  { %1271 = vmatpush3.bf16.msra.mxu1 %v1460_v27 }
 0x18f   :  { %1272 = vmatprep.subr.bf16.mxu1 %v1582_v60 }
 0x192   :  { %1273 = vmatpush3.bf16.msra.mxu1 %v1461_v28 }
 0x193   :  { %1274 = vmatprep.subr.bf16.mxu1 %v1582_v60 }
 0x196   :  { %1275 = vmatpush3.bf16.msra.mxu1 %v1462_v29 }
 0x197   :  { %1276 = vmatprep.subr.bf16.mxu1 %v1582_v60 }
 0x19a   :  { %1277 = vmatpush3.bf16.msra.mxu1 %v1463_v30 }
 0x19b   :  { %1278 = vmatprep.subr.bf16.mxu1 %v1582_v60 }
 0x19e   :  { %1279 = vmatpush3.bf16.msra.mxu1 %v1464_v31 }
 0x19f   :  { %1280 = vmatprep.subr.bf16.mxu1 %v1582_v60 }
 0x1a2   :  { %1281 = vmatpush3.bf16.msra.mxu1 %v1465_v32 }
 0x1a3   :  { %1282 = vmatprep.subr.bf16.mxu1 %v1582_v60 }
 0x1a6   :  { %1283 = vmatpush3.bf16.msra.mxu1 %v1466_v33 }
 0x249   :  { %v1253_v34 = vpop.f32.mrf.mxu1 }
 0x24b   :  { %v1254_v36 = vpop.f32.mrf.mxu1 }
 0x24c   :  { %v1255_v37 = vadd.f32 %v1254_v36, %v1253_v34 }
 0x24d   :  { %v1256_v38 = vpop.f32.mrf.mxu1 }
 0x24e   :  { %v988_v39 = vadd.f32 %v1255_v37, %v1211_v35 }
 0x24f   :  { %v1257_v40 = vpop.f32.mrf.mxu1 }
 0x250   :  { %v993_v41 = vmax.f32 %v988_v39, 0.0 }
 0x252   :  { %v994_v42 = vpack.c.bf16 %v993_v41, %v993_v41 }
 0x254   :  { %1285 = vmatmul.mubr.bf16.vlgmr.msra.gmra.mxu1 %v994_v42 }
 0x314   :  { %v1100_v44 = vpop.f32.mrf.mxu1 }
 0x315   :  { %v1101_v45 = vadd.f32 %v1228_v43, %v1100_v44 }
 0x316   :  { %v1286_v46 = vpop.f32.mrf.mxu1 }
 0x317   :  { %v1106_v47 = vpack.c.bf16 %v1101_v45, %v1101_v45 }
 0x318   :  { %v1103_v48 = vpop.f32.mrf.mxu1 }
 0x319   :  { %1107 = vst [vmem:[%s1661_s7] sm:$0xf] %v1106_v47 }
 0x31a   :  { %v1287_v49 = vpop.f32.mrf.mxu1 }
 0x31b   :  { %1112 = vsyncpa [#allocation3], 1 }
 0x31c   :  { %1113 = vsyncpa [#allocation5], 1 }
 0x31d   :  { %1114 = vsyncpa [#allocation8], 1 }

</bundles_post_ra>
